<compile_context>
chip_gen: v5e
topology: v5e:2x2
jax: 0.10.0
libtpu: 0.0.40
codegen_flags: <defaults>
</compile_context>

<pallas_src>
import functools

import jax
import jax.numpy as jnp
from jax import lax
from jax.experimental import pallas as pl
from jax.experimental.pallas import tpu as pltpu


def _gram_kernel(x_ref, o_ref, acc_ref, *, norm):
    # x_ref: (1, C, tk) tile of the flattened features, native dtype.
    # o_ref: (1, C, C) output tile. acc_ref: (C, C) f32 scratch accumulator.
    k_idx = pl.program_id(1)

    @pl.when(k_idx == 0)
    def _():
        acc_ref[...] = jnp.zeros_like(acc_ref)

    m = x_ref[0]  # (C, tk)
    # m @ m.T expressed as a dot_general contracting the minor (lane) axis of
    # both operands -> MXU matmul with transposed RHS, f32 accumulation.
    acc_ref[...] += lax.dot_general(
        m, m, (((1,), (1,)), ((), ())), preferred_element_type=jnp.float32
    )

    @pl.when(k_idx == pl.num_programs(1) - 1)
    def _():
        o_ref[0] = (acc_ref[...] * jnp.float32(norm)).astype(o_ref.dtype)


def _out_norm_factor(shape, out_norm: str) -> float:
    b, c, h, w = shape
    norm = 1.0
    if "b" in out_norm:
        norm /= b
    if "c" in out_norm:
        norm /= c
    if "i" in out_norm:
        norm /= h * w
    return norm


def gram_matrix(x, out_norm: str = "ci", tk: int | None = None):
    """x: (B, C, H, W). Returns (B, C, C) Gram matrices (same dtype as x)."""
    b, c, h, w = x.shape
    k = h * w
    norm = _out_norm_factor(x.shape, out_norm)

    mat = jnp.reshape(x, (b, c, k))  # no dtype cast: stream native dtype from HBM
    itemsize = jnp.dtype(x.dtype).itemsize

    # Pick the K tile: largest multiple-of-128 divisor of K whose (C, tk) slab
    # stays under ~4 MiB (leaves ample headroom for double-buffering on every
    # generation, including v7x's 64 MiB / v5e's 16 MiB scoped default).
    if tk is None:
        budget_bytes = 4 * 1024 * 1024
        tk = 0
        t = 128
        while t <= k:
            if k % t == 0 and c * t * itemsize <= budget_bytes:
                tk = t
            t += 128
        if tk == 0:
            tk = k  # K too small / not 128-aligned: single full-extent block
    else:
        if k % tk != 0 or (tk % 128 != 0 and tk != k):
            tk = k  # fall back to a safe full-K block
    nk = k // tk

    out = pl.pallas_call(
        functools.partial(_gram_kernel, norm=norm),
        out_shape=jax.ShapeDtypeStruct((b, c, c), x.dtype),
        grid_spec=pltpu.PrefetchScalarGridSpec(
            num_scalar_prefetch=0,
            grid=(b, nk),
            in_specs=[pl.BlockSpec((1, c, tk), lambda bi, ki: (bi, 0, ki))],
            out_specs=pl.BlockSpec((1, c, c), lambda bi, ki: (bi, 0, 0)),
            scratch_shapes=[pltpu.VMEM((c, c), jnp.float32)],
        ),
        compiler_params=pltpu.CompilerParams(
            dimension_semantics=("parallel", "arbitrary"),
        ),
        cost_estimate=pl.CostEstimate(
            flops=2 * b * c * c * k,
            transcendentals=0,
            bytes_accessed=b * c * k * itemsize + b * c * c * itemsize,
        ),
    )(mat)
    return out


def _reference_gram(x, out_norm: str = "ci"):
    """Pure-JAX reference mirroring the PyTorch forward."""
    b, c, h, w = x.shape
    norm = _out_norm_factor(x.shape, out_norm)
    mat = jnp.reshape(x, (b, c, h * w))
    return jnp.einsum("bck,bdk->bcd", mat, mat) * norm


if __name__ == "__main__":
    key = jax.random.PRNGKey(0)
    B, C, H, W = 2, 4, 16, 16
    x = jax.random.normal(key, (B, C, H, W), dtype=jnp.float32)

    out = jax.block_until_ready(gram_matrix(x))             # auto K tile
    ref = jax.block_until_ready(_reference_gram(x))
    assert out.shape == (B, C, C), out.shape
    assert jnp.allclose(out, ref, rtol=1e-5, atol=1e-5), (out, ref)

    # Exercise the multi-step K accumulation path explicitly (tk=128 -> 2 steps).
    out2 = jax.block_until_ready(gram_matrix(x, tk=128))
    assert jnp.allclose(out2, ref, rtol=1e-5, atol=1e-5), (out2, ref)

    print("KERNEL_OK")
</pallas_src>

<mosaic_0001>
module attributes {stable_mosaic.version = 11 : i64} {
  func.func @_gram_kernel(%arg0: i32, %arg1: i32, %arg2: memref<1x4x256xf32, #tpu.memory_space<vmem>>, %arg3: memref<1x4x4xf32, #tpu.memory_space<vmem>>, %arg4: memref<4x4xf32, #tpu.memory_space<vmem>>) attributes {dimension_semantics = [#tpu.dimension_semantics<parallel>, #tpu.dimension_semantics<arbitrary>], iteration_bounds = array<i64: 2, 1>, scalar_prefetch = 0 : i64, scratch_operands = 1 : i64, tpu.core_type = #tpu.core_type<tc>, window_params = [{transform_indices = @transform_0, window_bounds = array<i64: 1, 4, 256>}, {transform_indices = @transform_1, window_bounds = array<i64: 1, 4, 4>}]} {
    %c0_i32 = arith.constant 0 : i32
    %0 = arith.cmpi eq, %arg1, %c0_i32 : i32
    %1 = arith.extui %0 : i1 to i32
    %c0_i32_0 = arith.constant 0 : i32
    %2 = arith.cmpi ne, %1, %c0_i32_0 : i32
    scf.if %2 {
      %cst_9 = arith.constant 0.000000e+00 : f32
      %12 = vector.broadcast %cst_9 : f32 to vector<4x4xf32>
      %c0_10 = arith.constant 0 : index
      %c0_11 = arith.constant 0 : index
      %13 = vector.load %arg4[%c0_10, %c0_11] : memref<4x4xf32, #tpu.memory_space<vmem>>, vector<4x4xf32>
      tpu.vector_store %arg4[%c0_10, %c0_11], %12 {strides = array<i32>} : memref<4x4xf32, #tpu.memory_space<vmem>>, vector<4x4xf32>,
    } else {
    }
    %c0 = arith.constant 0 : index
    %c0_1 = arith.constant 0 : index
    %c0_2 = arith.constant 0 : index
    %3 = vector.load %arg2[%c0, %c0_1, %c0_2] : memref<1x4x256xf32, #tpu.memory_space<vmem>>, vector<1x4x256xf32>
    %4 = vector.shape_cast %3 : vector<1x4x256xf32> to vector<4x256xf32>
    %c0_3 = arith.constant 0 : index
    %c0_4 = arith.constant 0 : index
    %5 = vector.load %arg4[%c0_3, %c0_4] : memref<4x4xf32, #tpu.memory_space<vmem>>, vector<4x4xf32>
    %cst = arith.constant dense<0.000000e+00> : vector<4x4xf32>
    %6 = tpu.matmul %4, %4, %cst {dimension_numbers = #tpu.dot_dimension_numbers<[1], [1], [0], [0], [0, 0, 1, 0], [], []>} : vector<4x256xf32>, vector<4x256xf32>, vector<4x4xf32> -> vector<4x4xf32>
    %7 = arith.addf %5, %6 : vector<4x4xf32>
    %c0_5 = arith.constant 0 : index
    %c0_6 = arith.constant 0 : index
    %8 = vector.load %arg4[%c0_5, %c0_6] : memref<4x4xf32, #tpu.memory_space<vmem>>, vector<4x4xf32>
    tpu.vector_store %arg4[%c0_5, %c0_6], %7 {strides = array<i32>} : memref<4x4xf32, #tpu.memory_space<vmem>>, vector<4x4xf32>,
    %c0_i32_7 = arith.constant 0 : i32
    %9 = arith.cmpi eq, %arg1, %c0_i32_7 : i32
    %10 = arith.extui %9 : i1 to i32
    %c0_i32_8 = arith.constant 0 : i32
    %11 = arith.cmpi ne, %10, %c0_i32_8 : i32
    scf.if %11 {
      %c0_9 = arith.constant 0 : index
      %c0_10 = arith.constant 0 : index
      %12 = vector.load %arg4[%c0_9, %c0_10] : memref<4x4xf32, #tpu.memory_space<vmem>>, vector<4x4xf32>
      %cst_11 = arith.constant 9.765625E-4 : f32
      %13 = vector.broadcast %cst_11 : f32 to vector<4x4xf32>
      %14 = arith.mulf %12, %13 : vector<4x4xf32>
      %c0_12 = arith.constant 0 : index
      %c0_13 = arith.constant 0 : index
      %c0_14 = arith.constant 0 : index
      %15 = vector.load %arg3[%c0_12, %c0_13, %c0_14] : memref<1x4x4xf32, #tpu.memory_space<vmem>>, vector<1x4x4xf32>
      %16 = vector.shape_cast %15 : vector<1x4x4xf32> to vector<4x4xf32>
      %17 = vector.shape_cast %14 : vector<4x4xf32> to vector<1x4x4xf32>
      tpu.vector_store %arg3[%c0_12, %c0_13, %c0_14], %17 {strides = array<i32>} : memref<1x4x4xf32, #tpu.memory_space<vmem>>, vector<1x4x4xf32>,
    } else {
    }
    return
  }
  func.func @transform_0(%arg0: i32, %arg1: i32) -> (i32, i32, i32) {
    %c0_i32 = arith.constant 0 : i32
    %c0_i32_0 = arith.constant 0 : i32
    return %arg0, %c0_i32, %arg1 : i32, i32, i32
  }
  func.func @transform_1(%arg0: i32, %arg1: i32) -> (i32, i32, i32) {
    %c0_i32 = arith.constant 0 : i32
    %c0_i32_0 = arith.constant 0 : i32
    %c0_i32_1 = arith.constant 0 : i32
    return %arg0, %c0_i32, %c0_i32_0 : i32, i32, i32
  }
}

</mosaic_0001>

<bundles_post_ra>
// kernel: tpu_custom_call.1
= control target key start
LH: loop header
LB: loop body
LE: loop exit
PB: predicated region body
PF: predicated region fallthrough
CT: control target
= control target key end

     0   :  { %6 = vsyncpa [#allocation4], 0  ;;  %s644_s0 = inlined_call_operand.hbm [shape: f32[2,4,256], index: 0, kind: input, shape index: {}]   ;;  %s645_s1 = inlined_call_operand.hbm [shape: f32[2,4,4], index: 1, kind: output, shape index: {}]  }
   0x1   :  { %8 = vsyncpa [#allocation4 + $0x1], 0 }
   0x2   :  { %9 = vsyncpa [#allocation5], 0 }
   0x3   :  { %11 = vsyncpa [#allocation5 + $0x1], 0  ;;  %s520_s6 = smov 0   ;;  %s522_s7 = smov 0  }
   0x4   :  { %s524_s8 = smov 0   ;;  %s526_s9 = smov 0  }
   0x5   :  { %s528_s10 = smov 0   ;;  %s530_s11 = smov 0  }
   0x6 LB: > { %s317_s12 = sadd.s32 4294967295, %s507_s11   ;;  %s318_s13 = sadd.s32 4294967294, %s507_s11   ;;  %s507_s11 = sphi %s530_s11, %s17_s11   ;;  %s503_s10 = sphi %s528_s10, %s654_s10   ;;  %s499_s9 = sphi %s526_s9, %s653_s9   ;;  %s495_s8 = sphi %s524_s8, %s652_s8   ;;  %s491_s7 = sphi %s522_s7, %s651_s7   ;;  %s487_s6 = sphi %s520_s6, %s650_s6  }
   0x7   : > { %s29_s14 = sadd.s32 1, %s503_s10  ;;  %s38_s15 = sadd.s32 1, %s495_s8 }
   0x8   : > { %p31_p0 = scmp.ge.s32.totalorder %s29_s14, 2  ;;  %p45_p1 = scmp.ne.s32.totalorder %s495_s8, %s491_s7 }
   0x9   : > { %p46_p2 = scmp.eq.s32.totalorder %s507_s11, 0  ;;  %p51_p3 = scmp.ne.s32.totalorder %s491_s7, %s487_s6 }
   0xa   : > { %s656_s14 = smov (%p31_p0, %s29_s14), 0  ;;  %p52_p5 = scmp.eq.s32.totalorder %s317_s12, 0 }
   0xb   : > { %p561_p4 = por %p46_p2, %p45_p1  ;;  %s33_s17 = ssub.s32 %s503_s10, %s656_s14 }
   0xc   : > { %p75_p6 = scmp.eq.s32.totalorder %s317_s12, 1  ;;  %p36_p7 = scmp.eq.s32.totalorder %s33_s17, 0 }
   0xd   : > { %p567_p8 = por %p52_p5, %p51_p3  ;;  %p81_p10 = scmp.eq.s32.totalorder %s318_s13, 1 }
   0xe   : > { %p571_p9 = por %p75_p6, %p45_p1  ;;  %p320_p12 = scmp.ge.s32.totalorder %s507_s11, 2 }
   0xf   : > { %s576_s20 = scalar_select %p36_p7, %s495_s8, %s38_s15  }
  0x10   : > { %p578_p11 = por %p81_p10, %p51_p3  ;;  %p344_p13 = scmp.lt.s32.totalorder %s507_s11, 2 }
  0x11   : > { %s101_s22 = sand.u32 1, %s495_s8   ;;  %s331_s24 = sshll.u32 %s503_s10, 3 }
  0x12   : > { %s321_s23 = sshll.u32 %s101_s22, 3  ;;  %s112_s27 = scalar_lea.hbm %s644_s0, %s331_s24 }
  0x13   : > { %s105_s28 = scalar_lea.vmem [#allocation3], %s321_s23  ;;  %s114_s30 = sshll.u32 %s112_s27, 4  ;;  %s115_s30 = int_to_ptr.hbm [resolvable:$true] %s114_s30 }
  0x14   : > { %s116_s29 = sshll.u32 %s105_s28, 4  ;;  %p337_p0 = pnand %p344_p13, %p561_p4  ;;  %s117_s29 = int_to_ptr.vmem [resolvable:$true] %s116_s29 }
  0x15   : > { %p324_p1 = scmp.ge.s32.totalorder %s507_s11, 1  ;;  %p121_p2 = scmp.lt.s32.totalorder %s507_s11, 3 }
  0x16   : > { %s102_s2 = scalar_lea.sflag [#allocation4], %s101_s22 }
  0x17   : > { %339 = dma.hbm_to_vmem [thread:$0]  (!%p337_p0), %s115_s30, 128, %s117_s29, %s102_s2  }
  0x18   : > { %p122_p3 = pnand %p324_p1, %p121_p2 }
  0x19   : > { %s594_s3 = sand.u32 (!%p122_p3), 1, %s491_s7  }
  0x1a   : > { %125 = sbr.rel (%p122_p3) target bundleno = 195 (0xc3), region = 24  ;;  %s325_s4 = sshll.u32 (!%p122_p3), %s594_s3, 3 }
  0x1b   : > { %s128_s5 = scalar_lea.sflag (!%p122_p3), [#allocation4], %s594_s3  ;;  %s131_s12 = scalar_lea.vmem (!%p122_p3), [#allocation3], %s325_s4 }
  0x1f   : > { %478 = dma.done.wait (%p567_p8), %s128_s5, 128  }
  0x20   : > { %480 = vsyncadd (%p567_p8), %s128_s5, 4294967168  ;;  %v158_v0 = vld [vmem:[%s131_s12] sm:$0xff]  ;;  %vm156_vm0 = vcmask 27648   ;;  %v509_v5 = vmov 0.0   ;;  %s326_s13 = sshll.u32 %s594_s3, 2  ;;  %s328_s15 = sshll.u32 %s499_s9, 2 }
  0x21   : > { %161 = vst [vmem:[#allocation1] ss:$2 sm:$0xff] %v158_v0  ;;  %s231_s18 = scalar_lea.hbm %s645_s1, %s328_s15  ;;  %s150_s22 = scalar_lea.vmem [#allocation6], %s326_s13 }
  0x22   : > { %157 = vst.msk [vmem:[#allocation2] sm:$0xf] %vm156_vm0, %v509_v5  ;;  %s233_s23 = sshll.u32 %s150_s22, 4  ;;  %s235_s24 = sshll.u32 %s231_s18, 4  ;;  %s234_s23 = int_to_ptr.vmem [resolvable:$true] %s233_s23  ;;  %s236_s24 = int_to_ptr.hbm [resolvable:$true] %s235_s24 }
  0x23   : > { %s221_s25 = scalar_lea.sflag [#allocation5], %s594_s3  ;;  %s439_s26 = sshra.s32 %s236_s24, 4  ;;  %s440_s26 = int_to_ptr.hbm [resolvable:$true] %s439_s26 }
  0x24   : > { %s441_s9 = scalar_lea.hbm %s440_s26, 4  ;;  %s445_s29 = scalar_lea.hbm %s645_s1, 8 }
  0x25   : > { %p442_p4 = scmp.ne.s32.totalorder %s440_s26, %s441_s9  ;;  %p446_p7 = scmp.lt.s32.totalorder %s440_s26, %s645_s1 }
  0x26   : > { %p447_p8 = scmp.lt.s32.totalorder %s445_s29, %s441_s9 }
  0x27   : > { %p443_p5 = pnand %p442_p4, %p571_p9 }
  0x28   : > { %v162_v1 = vld.sshfl [vmem:[#allocation1] sm:$0xff pattern:$0x75316420]  ;;  %v163_v2 = vld.sshfl [vmem:[#allocation1 + $0x8] sm:$0xff pattern:$0x75316420]  ;;  %p448_p10 = por %p447_p8, %p446_p7 }
  0x29   : > { %166 = vst [vmem:[#allocation1] ss:$2 sm:$0xff] %v158_v0  ;;  %v159_v7 = vld [vmem:[#allocation2] sm:$0xf]  ;;  %p444_p6 = pneg %p443_p5 }
  0x2b   : > { %p449_p13 = pnand %p448_p10, %p444_p6 }
  0x30   : > { %v167_v3 = vld.sshfl [vmem:[#allocation1] sm:$0xff pattern:$0x75316420]  ;;  %v168_v4 = vld.sshfl [vmem:[#allocation1 + $0x8] sm:$0xff pattern:$0x75316420] }
  0x31   : > { %186 = vmatpush.xpose.msra.mxu0 %v167_v3  ;;  %206 = vmatpush.xpose.msra.mxu1 %v168_v4 }
  0x34   : > { %187 = vmatmul.f32.vlgmr.msra.gmra.mxu0 %v162_v1  ;;  %207 = vmatmul.f32.vlgmr.msra.gmra.mxu1 %v163_v2 }
  0xb1   : > { %v188_v6 = vpop.f32.mrf.mxu0  ;;  %v208_v8 = vpop.f32.mrf.mxu1 }
  0xb2   : > { %v209_v9 = vadd.f32 %v208_v8, %v188_v6 }
  0xb4   : > { %v211_v10 = vadd.f32 %v209_v9, %v159_v7 }
  0xb6   : > { %213 = vst.msk [vmem:[#allocation2] sm:$0xf] %vm156_vm0, %v211_v10 }
  0xbd   : > { %v217_v11 = vld [vmem:[#allocation2] sm:$0xf] }
  0xbe   : > { %v218_v12 = vmul.f32 0.0009765625, %v217_v11 }
  0xc0   : > { %219 = vst.msk [vmem:[%s150_s22] sm:$0xf] %vm156_vm0, %v218_v12 }
  0xc1   : > { %452 = shalt.err (!%p449_p13)
}
  0xc2   : > { %334 = dma.vmem_to_hbm [thread:$0]  (%p571_p9), %s234_s23, 64, %s236_s24, %s221_s25  }
  0xc3 PF: > { %s247_s3 = sand.u32 1, %s487_s6   ;;  %p341_p0 = pnand %p320_p12, %p578_p11 }
  0xc4   : > { %s248_s4 = scalar_lea.sflag [#allocation5], %s247_s3 }
  0xc5   : > { %p342_p1 = pneg %p341_p0 }
  0xc7   : > { %482 = dma.done.wait (%p342_p1), %s248_s4, 64  }
  0xc8   : > { %484 = vsyncadd (%p342_p1), %s248_s4, 4294967232  ;;  %s17_s11 = sadd.s32 1, %s507_s11   ;;  %s650_s6 = smov %s491_s7 }
  0xc9   : > { %p14_p2 = scmp.ge.s32.totalorder %s17_s11, 4   ;;  %s651_s7 = smov %s495_s8 }
  0xca   : > { %s652_s8 = smov %s576_s20  ;;  %s653_s9 = smov %s503_s10 }
  0xcb   : > { %s654_s10 = smov %s656_s14  ;;  %16 = sbr.rel (!%p14_p2) target bundleno = 6 (0x6), region = 77 }
  0xd0   :  { %254 = vsyncpa [#allocation4], 1 }
  0xd1   :  { %256 = vsyncpa [#allocation4 + $0x1], 1 }
  0xd2   :  { %257 = vsyncpa [#allocation5], 1 }
  0xd3   :  { %259 = vsyncpa [#allocation5 + $0x1], 1 }

</bundles_post_ra>
